<compile_context>
chip_gen: v7x
topology: tpu7x:2x2x1
jax: 0.10.0
libtpu: 0.0.40
codegen_flags: <defaults>
</compile_context>

<pallas_src>
import functools

import numpy as np
import jax
import jax.numpy as jnp
from jax.experimental import pallas as pl
from jax.experimental.pallas import tpu as pltpu

PREC = jax.lax.Precision.HIGHEST


def _st_gcn_kernel(x_ref, wgr_ref, wt_ref, b_ref, o_ref, *, T):
    # x_ref  : (rows, V*Cin)        bf16 lane-dense input block (rows = Nb*T)
    # wgr_ref: (V*Cin, 2*V*Cout)    bf16 fused [gcn+A+BN1 | residual+BN] weight
    # wt_ref : (kt, V*Cout, V*Cout) bf16 per-tap temporal conv (+BN2) weight
    # b_ref  : (2, V*Cout)          f32  row0: gcn bias, row1: tcn + residual bias
    # o_ref  : (rows, V*Cout)       f32
    rows, _ = x_ref.shape
    VCout = o_ref.shape[-1]
    kt = wt_ref.shape[0]
    pad = (kt - 1) // 2

    x = x_ref[...]
    b = b_ref[...]

    # ---- fused gcn + residual: one (rows,64)x(64,256) MXU matmul -> [g | r] ----
    gr = jnp.dot(x, wgr_ref[...], preferred_element_type=jnp.float32)
    g = gr[:, :VCout]            # static lane slice at a 128 boundary: no relayout
    r = gr[:, VCout:]

    h = jnp.maximum(g + b[0:1, :], 0.0)          # BN1 + ReLU epilogue in f32
    h_c = h.astype(wt_ref.dtype)

    # time index within each sample for this block's rows (blocks are aligned to
    # sample starts, so the local row index mod T is the temporal position).
    t_idx = jax.lax.broadcasted_iota(jnp.int32, (rows, VCout), 0) % T

    # ---- tcn: per-tap temporally shifted copies of h via sublane roll + mask.
    # Tap dt needs h[t + dt - pad] with zero rows supplying the 'same' padding;
    # the roll is XLU work and the mask is VPU work, both off the MXU-push slot.
    tout = jnp.dot(h_c, wt_ref[pad], preferred_element_type=jnp.float32)  # s == 0 tap
    for dt in range(kt):
        s = dt - pad
        if s == 0:
            continue
        rolled = pltpu.roll(h, shift=(-s) % rows, axis=0)   # rolled[r] = h[(r+s) % rows]
        valid = (t_idx < T - s) if s > 0 else (t_idx >= -s)  # zero the padded rows
        shifted = jnp.where(valid, rolled, 0.0)
        tout = tout + jnp.dot(shifted.astype(wt_ref.dtype), wt_ref[dt],
                              preferred_element_type=jnp.float32)

    out = jnp.maximum(tout + r + b[1:2, :], 0.0)             # f32 epilogue
    o_ref[...] = out.astype(o_ref.dtype)


def _pick_samples_per_block(N, T, target_rows=256, max_rows=2048):
    """Pick Nb so rows=Nb*T fills the MXU, keeping >=2 grid steps when possible."""
    divs = [d for d in range(1, N + 1) if N % d == 0]
    cand = [d for d in divs if N // d >= 2] or divs    # >=2 steps -> v7x megacore
    for d in cand:
        if target_rows <= d * T <= max_rows:
            return d
    fit = [d for d in cand if d * T <= max_rows]
    return fit[-1] if fit else cand[0]


def st_gcn_block_forward(x_nchw, A, params, *, samples_per_block=None,
                         compute_dtype=jnp.bfloat16):
    """x_nchw: (N, Cin, T, V), A: (K, V, V) -> ((N, Cout, T, V), A)."""
    N, Cin, T, V = x_nchw.shape
    K = A.shape[0]
    kt, _, Cout = params['w_tcn'].shape
    assert kt % 2 == 1
    Nb = samples_per_block or _pick_samples_per_block(N, T)
    assert N % Nb == 0, "samples_per_block must divide N"
    rows = Nb * T
    f32 = jnp.float32
    VCin, VCout = V * Cin, V * Cout

    Af = A.astype(f32)
    s1, h1 = params['s1'].astype(f32), params['h1'].astype(f32)
    s2, h2 = params['s2'].astype(f32), params['h2'].astype(f32)
    sr, hr = params['s_res'].astype(f32), params['h_res'].astype(f32)

    # ---- gcn (+ A contraction + BN1) folded weight / bias ----
    wg3 = params['w_gcn'].astype(f32).reshape(Cin, K, Cout)
    Wg = jnp.einsum('kvw,ikc->viwc', Af, wg3, precision=PREC) * s1[None, None, None, :]
    Wg = Wg.reshape(VCin, VCout)
    bg3 = params['b_gcn'].astype(f32).reshape(K, Cout)
    bg = jnp.einsum('kw,kc->wc', Af.sum(axis=1), bg3,
                    precision=PREC) * s1[None, :] + h1[None, :]
    bg = bg.reshape(VCout)

    # ---- temporal conv (+ BN2): per-tap kron(I_V, w_tcn[dt]*s2) ----
    eyeV = jnp.eye(V, dtype=f32)
    wt_s = params['w_tcn'].astype(f32) * s2[None, None, :]
    Wt = jnp.einsum('vw,kcd->kvcwd', eyeV, wt_s).reshape(kt, VCout, VCout)
    bt = jnp.tile(params['b_tcn'].astype(f32) * s2 + h2, V)

    # ---- residual 1x1 conv (+ BN) ----
    # TODO(synk): only the conv+BN residual path with temporal stride=1 is
    # implemented; identity / no-residual / stride=2 variants are not handled.
    wr_s = params['w_res'].astype(f32) * sr[None, :]
    Wr = jnp.einsum('vw,id->viwd', eyeV, wr_s).reshape(VCin, VCout)
    br = jnp.tile(params['b_res'].astype(f32) * sr + hr, V)

    # gcn and residual share x: fuse into one (VCin, 2*VCout) weight so a single
    # matmul fills the 256-wide v6e/v7x MXU and x passes through the MXU once.
    Wgr = jnp.concatenate([Wg, Wr], axis=1).astype(compute_dtype)
    Wt = Wt.astype(compute_dtype)
    biases = jnp.stack([bg, bt + br], axis=0)                  # (2, V*Cout) f32

    # Lane-dense activations as one (N*T, V*Cin) slab in bf16 (halves DMA bytes;
    # accumulation stays f32 inside the kernel).
    x_lane = jnp.transpose(x_nchw.astype(f32), (0, 2, 3, 1)).reshape(N * T, VCin)
    x_lane = x_lane.astype(compute_dtype)

    itemsize = np.dtype(compute_dtype).itemsize
    flops = 2 * N * T * (VCin * 2 * VCout + kt * VCout * VCout)
    bytes_accessed = ((x_lane.size + Wgr.size + Wt.size) * itemsize
                      + biases.size * 4 + N * T * VCout * 4)
    # Explicit VMEM budget: double-buffered x/out blocks + (double-buffered)
    # weights; sized so large Nb*T blocks stay pipelined on v7x's 64 MiB
    # (32 MiB default-scoped) VMEM as well as v5e/v6e.
    block_bytes = 2 * rows * (VCin * itemsize + VCout * 4)
    weight_bytes = 2 * ((Wgr.size + Wt.size) * itemsize + biases.size * 4)
    vmem_limit = int(min(32 * 2**20, max(4 * 2**20, 4 * (block_bytes + weight_bytes))))

    out = pl.pallas_call(
        functools.partial(_st_gcn_kernel, T=T),
        out_shape=jax.ShapeDtypeStruct((N * T, VCout), f32),
        grid_spec=pltpu.PrefetchScalarGridSpec(
            num_scalar_prefetch=0,
            grid=(N // Nb,),
            in_specs=[
                pl.BlockSpec((rows, VCin), lambda n: (n, 0)),
                # TODO(synk): the constant-index weight/bias blocks could use
                # pipeline_mode=pl.Buffered(1) (or a scratch preload) to drop the
                # second pipeline buffer; negligible VMEM at these weight sizes.
                pl.BlockSpec((VCin, 2 * VCout), lambda n: (0, 0)),
                pl.BlockSpec((kt, VCout, VCout), lambda n: (0, 0, 0)),
                pl.BlockSpec((2, VCout), lambda n: (0, 0)),
            ],
            out_specs=pl.BlockSpec((rows, VCout), lambda n: (n, 0)),
        ),
        compiler_params=pltpu.CompilerParams(
            dimension_semantics=("parallel",),
            vmem_limit_bytes=vmem_limit),
        cost_estimate=pl.CostEstimate(flops=flops, transcendentals=0,
                                      bytes_accessed=bytes_accessed),
    )(x_lane, Wgr, Wt, biases)

    out_nchw = jnp.transpose(out.reshape(N, T, V, Cout), (0, 3, 1, 2))
    return out_nchw, A


def st_gcn_block_reference(x, A, params):
    """Pure-JAX reference in PyTorch NCHW layout (f32)."""
    N, Cin, T, V = x.shape
    kt = params['w_tcn'].shape[0]
    Cout = params['w_tcn'].shape[-1]
    pad = (kt - 1) // 2

    y = jnp.einsum('co,nctv->notv', params['w_gcn'], x, precision=PREC) \
        + params['b_gcn'][None, :, None, None]                 # (N, K*Cout, T, V)
    y = y.reshape(N, A.shape[0], Cout, T, V)
    g = jnp.einsum('nkctv,kvw->nctw', y, A, precision=PREC)

    def bn(z, s, h):
        return z * s[None, :, None, None] + h[None, :, None, None]

    h = jnp.maximum(bn(g, params['s1'], params['h1']), 0.0)
    hp = jnp.pad(h, ((0, 0), (0, 0), (pad, pad), (0, 0)))
    tout = jnp.zeros((N, Cout, T, V)) + params['b_tcn'][None, :, None, None]
    for dt in range(kt):
        tout = tout + jnp.einsum('cd,nctv->ndtv', params['w_tcn'][dt],
                                 hp[:, :, dt:dt + T, :], precision=PREC)
    tout = bn(tout, params['s2'], params['h2'])

    r = jnp.einsum('cd,nctv->ndtv', params['w_res'], x, precision=PREC) \
        + params['b_res'][None, :, None, None]
    r = bn(r, params['s_res'], params['h_res'])
    return jnp.maximum(tout + r, 0.0), A


def make_params(key, Cin, Cout, K, kt):
    eps = 1e-5
    ks = jax.random.split(key, 18)

    def bn_fold(kg, kb, km, kv):
        gamma = 1.0 + 0.1 * jax.random.normal(kg, (Cout,), jnp.float32)
        beta = 0.1 * jax.random.normal(kb, (Cout,), jnp.float32)
        mean = 0.1 * jax.random.normal(km, (Cout,), jnp.float32)
        var = jax.random.uniform(kv, (Cout,), jnp.float32, 0.5, 1.5)
        s = gamma / jnp.sqrt(var + eps)
        return s, beta - mean * s

    s1, h1 = bn_fold(ks[0], ks[1], ks[2], ks[3])
    s2, h2 = bn_fold(ks[4], ks[5], ks[6], ks[7])
    sr, hr = bn_fold(ks[8], ks[9], ks[10], ks[11])
    w_gcn = 0.2 * jax.random.normal(ks[12], (Cin, K * Cout), jnp.float32)
    b_gcn = 0.1 * jax.random.normal(ks[13], (K * Cout,), jnp.float32)
    w_tcn = 0.2 * jax.random.normal(ks[14], (kt, Cout, Cout), jnp.float32)
    b_tcn = 0.1 * jax.random.normal(ks[15], (Cout,), jnp.float32)
    w_res = 0.2 * jax.random.normal(ks[16], (Cin, Cout), jnp.float32)
    b_res = 0.1 * jax.random.normal(ks[17], (Cout,), jnp.float32)
    return dict(w_gcn=w_gcn, b_gcn=b_gcn, s1=s1, h1=h1,
                w_tcn=w_tcn, b_tcn=b_tcn, s2=s2, h2=h2,
                w_res=w_res, b_res=b_res, s_res=sr, h_res=hr)


if __name__ == "__main__":
    # st_gcn_block(in_channels=4, out_channels=8, kernel_size=(3, 2), stride=1,
    #              dropout=0, residual=True)  -- residual takes the conv+BN path.
    N, Cin, Cout, T, V, K, kt = 2, 4, 8, 16, 16, 2, 3

    key = jax.random.PRNGKey(0)
    kx, ka, kp = jax.random.split(key, 3)
    x = jax.random.normal(kx, (N, Cin, T, V), jnp.float32)
    A = 0.3 * jax.random.normal(ka, (K, V, V), jnp.float32)
    params = make_params(kp, Cin, Cout, K, kt)

    out, A_out = st_gcn_block_forward(x, A, params)
    out = jax.block_until_ready(out)

    ref, _ = st_gcn_block_reference(x, A, params)
    # Tolerance relaxed for the bf16 activation/weight path (f32 accumulation).
    np.testing.assert_allclose(np.asarray(out), np.asarray(ref),
                               rtol=2e-2, atol=5e-2)
    # TODO(synk): BatchNorm is folded in eval (running-stats) mode; training-mode
    # batch statistics are not reproduced.  Dropout(p>0) is not implemented.
    print("KERNEL_OK")
</pallas_src>

<mosaic_0001>
module attributes {stable_mosaic.version = 11 : i64} {
  func.func @_st_gcn_kernel(%arg0: i32, %arg1: memref<16x64xbf16, #tpu.memory_space<vmem>>, %arg2: memref<64x256xbf16, #tpu.memory_space<vmem>>, %arg3: memref<3x128x128xbf16, #tpu.memory_space<vmem>>, %arg4: memref<2x128xf32, #tpu.memory_space<vmem>>, %arg5: memref<16x128xf32, #tpu.memory_space<vmem>>) attributes {dimension_semantics = [#tpu.dimension_semantics<parallel>], iteration_bounds = array<i64: 2>, scalar_prefetch = 0 : i64, scratch_operands = 0 : i64, tpu.core_type = #tpu.core_type<tc>, window_params = [{transform_indices = @transform_0, window_bounds = array<i64: 16, 64>}, {pipeline_mode = #tpu.pipeline_mode<synchronous>, transform_indices = @transform_1, window_bounds = array<i64: 64, 256>}, {pipeline_mode = #tpu.pipeline_mode<synchronous>, transform_indices = @transform_2, window_bounds = array<i64: 3, 128, 128>}, {pipeline_mode = #tpu.pipeline_mode<synchronous>, transform_indices = @transform_3, window_bounds = array<i64: 2, 128>}, {transform_indices = @transform_4, window_bounds = array<i64: 16, 128>}]} {
    %c0 = arith.constant 0 : index
    %c0_0 = arith.constant 0 : index
    %0 = vector.load %arg1[%c0, %c0_0] : memref<16x64xbf16, #tpu.memory_space<vmem>>, vector<16x64xbf16>
    %c0_1 = arith.constant 0 : index
    %c0_2 = arith.constant 0 : index
    %1 = vector.load %arg4[%c0_1, %c0_2] : memref<2x128xf32, #tpu.memory_space<vmem>>, vector<2x128xf32>
    %c0_3 = arith.constant 0 : index
    %c0_4 = arith.constant 0 : index
    %2 = vector.load %arg2[%c0_3, %c0_4] : memref<64x256xbf16, #tpu.memory_space<vmem>>, vector<64x256xbf16>
    %cst = arith.constant dense<0.000000e+00> : vector<16x256xf32>
    %3 = tpu.matmul %0, %2, %cst {dimension_numbers = #tpu.dot_dimension_numbers<[1], [0], [0], [1], [0, 0, 1, 1], [], []>} : vector<16x64xbf16>, vector<64x256xbf16>, vector<16x256xf32> -> vector<16x256xf32>
    %4 = vector.extract_strided_slice %3 {offsets = [0, 0], sizes = [16, 128], strides = [1, 1]} : vector<16x256xf32> to vector<16x128xf32>
    %5 = vector.extract_strided_slice %3 {offsets = [0, 128], sizes = [16, 128], strides = [1, 1]} : vector<16x256xf32> to vector<16x128xf32>
    %6 = vector.extract_strided_slice %1 {offsets = [0, 0], sizes = [1, 128], strides = [1, 1]} : vector<2x128xf32> to vector<1x128xf32>
    %7 = vector.broadcast %6 : vector<1x128xf32> to vector<16x128xf32>
    %8 = arith.addf %4, %7 : vector<16x128xf32>
    %cst_5 = arith.constant 0.000000e+00 : f32
    %9 = vector.broadcast %cst_5 : f32 to vector<16x128xf32>
    %10 = arith.maximumf %8, %9 : vector<16x128xf32>
    %11 = arith.truncf %10 : vector<16x128xf32> to vector<16x128xbf16>
    %12 = tpu.iota {dimensions = array<i32: 0>} : vector<16x128xi32>
    %c16_i32 = arith.constant 16 : i32
    %c0_i32 = arith.constant 0 : i32
    %13 = arith.cmpi eq, %c16_i32, %c0_i32 : i32
    %c1_i32 = arith.constant 1 : i32
    %14 = arith.select %13, %c1_i32, %c16_i32 : i32
    %15 = vector.broadcast %14 : i32 to vector<16x128xi32>
    %16 = arith.remsi %12, %15 : vector<16x128xi32>
    %c0_i32_6 = arith.constant 0 : i32
    %17 = vector.broadcast %c0_i32_6 : i32 to vector<16x128xi32>
    %18 = arith.cmpi ne, %16, %17 : vector<16x128xi32>
    %c0_i32_7 = arith.constant 0 : i32
    %19 = vector.broadcast %c0_i32_7 : i32 to vector<16x128xi32>
    %20 = arith.cmpi slt, %16, %19 : vector<16x128xi32>
    %c0_i32_8 = arith.constant 0 : i32
    %21 = arith.cmpi slt, %14, %c0_i32_8 : i32
    %22 = vector.broadcast %21 : i1 to vector<16x128xi1>
    %23 = vector.broadcast %22 : vector<16x128xi1> to vector<16x128xi1>
    %24 = arith.xori %20, %23 : vector<16x128xi1>
    %25 = arith.andi %24, %18 : vector<16x128xi1>
    %26 = vector.broadcast %14 : i32 to vector<16x128xi32>
    %27 = arith.addi %16, %26 : vector<16x128xi32>
    %28 = arith.select %25, %27, %16 : vector<16x128xi1>, vector<16x128xi32>
    %c1 = arith.constant 1 : index
    %c0_9 = arith.constant 0 : index
    %c0_10 = arith.constant 0 : index
    %29 = vector.load %arg3[%c1, %c0_9, %c0_10] : memref<3x128x128xbf16, #tpu.memory_space<vmem>>, vector<1x128x128xbf16>
    %30 = vector.shape_cast %29 : vector<1x128x128xbf16> to vector<128x128xbf16>
    %cst_11 = arith.constant dense<0.000000e+00> : vector<16x128xf32>
    %31 = tpu.matmul %11, %30, %cst_11 {dimension_numbers = #tpu.dot_dimension_numbers<[1], [0], [0], [1], [0, 0, 1, 1], [], []>} : vector<16x128xbf16>, vector<128x128xbf16>, vector<16x128xf32> -> vector<16x128xf32>
    %c1_i32_12 = arith.constant 1 : i32
    %32 = tpu.dynamic_rotate %10 by %c1_i32_12 dim 0 : vector<16x128xf32>, i32 -> vector<16x128xf32>
    %c1_i32_13 = arith.constant 1 : i32
    %33 = vector.broadcast %c1_i32_13 : i32 to vector<16x128xi32>
    %34 = arith.cmpi sge, %28, %33 : vector<16x128xi32>
    %cst_14 = arith.constant 0.000000e+00 : f32
    %35 = vector.broadcast %cst_14 : f32 to vector<16x128xf32>
    %36 = arith.select %34, %32, %35 : vector<16x128xi1>, vector<16x128xf32>
    %37 = arith.truncf %36 : vector<16x128xf32> to vector<16x128xbf16>
    %c0_15 = arith.constant 0 : index
    %c0_16 = arith.constant 0 : index
    %c0_17 = arith.constant 0 : index
    %38 = vector.load %arg3[%c0_15, %c0_16, %c0_17] : memref<3x128x128xbf16, #tpu.memory_space<vmem>>, vector<1x128x128xbf16>
    %39 = vector.shape_cast %38 : vector<1x128x128xbf16> to vector<128x128xbf16>
    %cst_18 = arith.constant dense<0.000000e+00> : vector<16x128xf32>
    %40 = tpu.matmul %37, %39, %cst_18 {dimension_numbers = #tpu.dot_dimension_numbers<[1], [0], [0], [1], [0, 0, 1, 1], [], []>} : vector<16x128xbf16>, vector<128x128xbf16>, vector<16x128xf32> -> vector<16x128xf32>
    %41 = arith.addf %31, %40 : vector<16x128xf32>
    %c15_i32 = arith.constant 15 : i32
    %42 = tpu.dynamic_rotate %10 by %c15_i32 dim 0 : vector<16x128xf32>, i32 -> vector<16x128xf32>
    %c15_i32_19 = arith.constant 15 : i32
    %43 = vector.broadcast %c15_i32_19 : i32 to vector<16x128xi32>
    %44 = arith.cmpi slt, %28, %43 : vector<16x128xi32>
    %cst_20 = arith.constant 0.000000e+00 : f32
    %45 = vector.broadcast %cst_20 : f32 to vector<16x128xf32>
    %46 = arith.select %44, %42, %45 : vector<16x128xi1>, vector<16x128xf32>
    %47 = arith.truncf %46 : vector<16x128xf32> to vector<16x128xbf16>
    %c2 = arith.constant 2 : index
    %c0_21 = arith.constant 0 : index
    %c0_22 = arith.constant 0 : index
    %48 = vector.load %arg3[%c2, %c0_21, %c0_22] : memref<3x128x128xbf16, #tpu.memory_space<vmem>>, vector<1x128x128xbf16>
    %49 = vector.shape_cast %48 : vector<1x128x128xbf16> to vector<128x128xbf16>
    %cst_23 = arith.constant dense<0.000000e+00> : vector<16x128xf32>
    %50 = tpu.matmul %47, %49, %cst_23 {dimension_numbers = #tpu.dot_dimension_numbers<[1], [0], [0], [1], [0, 0, 1, 1], [], []>} : vector<16x128xbf16>, vector<128x128xbf16>, vector<16x128xf32> -> vector<16x128xf32>
    %51 = arith.addf %41, %50 : vector<16x128xf32>
    %52 = arith.addf %51, %5 : vector<16x128xf32>
    %53 = vector.extract_strided_slice %1 {offsets = [1, 0], sizes = [1, 128], strides = [1, 1]} : vector<2x128xf32> to vector<1x128xf32>
    %54 = vector.broadcast %53 : vector<1x128xf32> to vector<16x128xf32>
    %55 = arith.addf %52, %54 : vector<16x128xf32>
    %cst_24 = arith.constant 0.000000e+00 : f32
    %56 = vector.broadcast %cst_24 : f32 to vector<16x128xf32>
    %57 = arith.maximumf %55, %56 : vector<16x128xf32>
    %c0_25 = arith.constant 0 : index
    %c0_26 = arith.constant 0 : index
    %58 = vector.load %arg5[%c0_25, %c0_26] : memref<16x128xf32, #tpu.memory_space<vmem>>, vector<16x128xf32>
    tpu.vector_store %arg5[%c0_25, %c0_26], %57 {strides = array<i32>} : memref<16x128xf32, #tpu.memory_space<vmem>>, vector<16x128xf32>,
    return
  }
  func.func @transform_0(%arg0: i32) -> (i32, i32) {
    %c0_i32 = arith.constant 0 : i32
    %c0_i32_0 = arith.constant 0 : i32
    return %arg0, %c0_i32 : i32, i32
  }
  func.func @transform_1(%arg0: i32) -> (i32, i32) {
    %c0_i32 = arith.constant 0 : i32
    %c0_i32_0 = arith.constant 0 : i32
    %c0_i32_1 = arith.constant 0 : i32
    return %c0_i32, %c0_i32_0 : i32, i32
  }
  func.func @transform_2(%arg0: i32) -> (i32, i32, i32) {
    %c0_i32 = arith.constant 0 : i32
    %c0_i32_0 = arith.constant 0 : i32
    %c0_i32_1 = arith.constant 0 : i32
    %c0_i32_2 = arith.constant 0 : i32
    return %c0_i32, %c0_i32_0, %c0_i32_1 : i32, i32, i32
  }
  func.func @transform_3(%arg0: i32) -> (i32, i32) {
    %c0_i32 = arith.constant 0 : i32
    %c0_i32_0 = arith.constant 0 : i32
    %c0_i32_1 = arith.constant 0 : i32
    return %c0_i32, %c0_i32_0 : i32, i32
  }
  func.func @transform_4(%arg0: i32) -> (i32, i32) {
    %c0_i32 = arith.constant 0 : i32
    %c0_i32_0 = arith.constant 0 : i32
    return %arg0, %c0_i32 : i32, i32
  }
}

</mosaic_0001>

<bundles_post_ra>
// kernel: tpu_custom_call.1
= control target key start
LH: loop header
LB: loop body
LE: loop exit
PB: predicated region body
PF: predicated region fallthrough
CT: control target
= control target key end

     0   :  { %9 = vsyncpa [#allocation3], 0  ;;  %s1594_s0 = inlined_call_operand.hbm [shape: bf16[32,64], index: 0, kind: input, shape index: {}]   ;;  %s1595_s1 = inlined_call_operand.hbm [shape: bf16[64,256], index: 1, kind: input, shape index: {}]   ;;  %s1596_s2 = inlined_call_operand.hbm [shape: bf16[3,128,128], index: 2, kind: input, shape index: {}]   ;;  %s1597_s3 = inlined_call_operand.vmem [shape: f32[2,128], index: 3, kind: input, shape index: {}]   ;;  %s1598_s4 = inlined_call_operand.hbm [shape: f32[32,128], index: 4, kind: output, shape index: {}]  }
   0x1   :  { %11 = vsyncpa [#allocation3 + $0x1], 0 }
   0x2   :  { %12 = vsyncpa [#allocation6], 0 }
   0x3   :  { %13 = vsyncpa [#allocation4], 0 }
   0x4   :  { %15 = vsyncpa [#allocation4 + $0x1], 0  ;;  %s1308_s15 = smov 0   ;;  %s1310_s16 = smov 0  }
   0x5   :  { %s1312_s17 = smov 0   ;;  %s1314_s18 = smov 0  }
   0x6 LB: > { %s1329_s19 = sadd.s32 4294967295, %s1267_s18   ;;  %s844_s20 = sadd.s32 4294967294, %s1267_s18   ;;  %s1267_s18 = sphi %s1314_s18, %s1618_s18   ;;  %s1263_s17 = sphi %s1312_s17, %s1617_s17   ;;  %s1259_s16 = sphi %s1310_s16, %s1616_s16   ;;  %s1255_s15 = sphi %s1308_s15, %s1615_s15  }
   0x7   : > { %p41_p0 = scmp.ne.s32.totalorder %s1259_s16, %s1255_s15  ;;  %p1599_p1 = scmp.eq.s32.totalorder %s1329_s19, 0 }
   0x8   : > { %p134_p3 = scmp.eq.s32.totalorder %s844_s20, 1  ;;  %p845_p5 = scmp.ge.s32.totalorder %s1267_s18, 1 }
   0x9   : > { %p1338_p4 = por %p1599_p1, %p41_p0  ;;  %p141_p7 = scmp.lt.s32.totalorder %s1267_s18, 3 }
   0xa   : > { %p1343_p6 = por %p134_p3, %p41_p0  ;;  %s1269_s24 = smov [#allocation5]  }
   0xb   : > { %s1602_s21 = scalar_select %p1338_p4, 1, 0 }
   0xc   : > { %s1603_s22 = scalar_select %p1343_p6, 1, 0 }
   0xd   : > { %p1348_p8 = pnand %p845_p5, %p141_p7  ;;  %s153_s25 = sshll.u32 %s1269_s24, 4  ;;  %s1352_s25 = int_to_ptr.vmem [resolvable:$true] %s153_s25 }
   0xe   : > { %s1270_s27 = smov [#allocation7]   ;;  %s1111_s5 = scalar_lea.hbm %s1595_s1, 1024 }
   0xf   : > { %p1009_p9 = pneg %p1348_p8  ;;  %s166_s28 = sshll.u32 %s1270_s27, 4  ;;  %s1363_s28 = int_to_ptr.vmem [resolvable:$true] %s166_s28 }
  0x10   : > { %p1112_p12 = scmp.ne.s32.totalorder %s1595_s1, %s1111_s5  ;;  %p1118_p5 = scmp.lt.u32.totalorder %s1111_s5, %s1595_s1 }
  0x11   : > { %p1359_p11 = pnand %p1009_p9, %p1599_p1 }
  0x13   : > { %p1113_p13 = pneg %p1359_p11 }
  0x15   : > { %p1114_p0 = pnand %p1113_p13, %p1112_p12 }
  0x17   : > { %p1115_p3 = pneg %p1114_p0 }
  0x19   : > { %p1120_p7 = pnand %p1118_p5, %p1115_p3 }
  0x1b   : > { %1123 = shalt.err (!%p1120_p7)
}
  0x1c   : > { %s1124_s10 = scalar_lea.vmem %s1352_s25, 1024  ;;  %p1132_p2 = scmp.lt.s32.totalorder %s1352_s25, %s1352_s25 }
  0x1d   : > { %p1125_p9 = scmp.ne.s32.totalorder %s1352_s25, %s1124_s10  ;;  %p1133_p12 = scmp.lt.s32.totalorder %s1124_s10, %s1124_s10 }
  0x1f   : > { %p1127_p10 = pnand %p1125_p9, %p1113_p13  ;;  %p1134_p0 = por %p1133_p12, %p1132_p2 }
  0x21   : > { %p1128_p1 = pneg %p1127_p10 }
  0x23   : > { %p1135_p6 = pnand %p1134_p0, %p1128_p1 }
  0x25   : > { %1138 = shalt.err (!%p1135_p6)
}
  0x26   : > { %s1271_s11 = smov 128   ;;  %s1272_s12 = smov 8  }
  0x27   : > { %1012 = dma.hbm_to_vmem [thread:$0]  (!%p1359_p11), %s1595_s1, 1024, %s1352_s25, [#allocation6], %s1271_s11, %s1271_s11, %s1272_s12  }
  0x28   : > { %s1139_s27 = scalar_lea.hbm %s1596_s2, 3072 }
  0x29   : > { %p1140_p2 = scmp.ne.s32.totalorder %s1596_s2, %s1139_s27  ;;  %p1146_p10 = scmp.lt.u32.totalorder %s1139_s27, %s1596_s2 }
  0x2b   : > { %p1142_p1 = pnand %p1140_p2, %p1113_p13 }
  0x2d   : > { %p1143_p6 = pneg %p1142_p1 }
  0x2f   : > { %p1148_p3 = pnand %p1146_p10, %p1143_p6 }
  0x31   : > { %1151 = shalt.err (!%p1148_p3)
}
  0x32   : > { %s1152_s25 = scalar_lea.vmem %s1363_s28, 3072  ;;  %p1160_p12 = scmp.lt.s32.totalorder %s1363_s28, %s1363_s28 }
  0x33   : > { %p1153_p5 = scmp.ne.s32.totalorder %s1363_s28, %s1152_s25  ;;  %p1161_p0 = scmp.lt.s32.totalorder %s1152_s25, %s1152_s25 }
  0x35   : > { %p1155_p7 = pnand %p1153_p5, %p1113_p13  ;;  %p1162_p2 = por %p1161_p0, %p1160_p12 }
  0x37   : > { %p1156_p9 = pneg %p1155_p7 }
  0x39   : > { %p1163_p1 = pnand %p1162_p2, %p1156_p9 }
  0x3b   : > { %1166 = shalt.err (!%p1163_p1)
}
  0x3c   : > { %s1273_s7 = smov 64   ;;  %s1274_s8 = smov 4  }
  0x3d   : > { %1015 = dma.hbm_to_vmem [thread:$0]  (!%p1359_p11), %s1596_s2, 3072, %s1363_s28, [#allocation6], %s1273_s7, %s1273_s7, %s1274_s8  }
  0x3e   : > { %s1421_s11 = sadd.s32 1, %s1267_s18   ;;  %s28_s13 = sadd.s32 1, %s1263_s17 }
  0x3f   : > { %s25_s12 = ssub.s32 %s1267_s18, %s1421_s11  ;;  %p35_p6 = scmp.ne.s32.totalorder %s1263_s17, %s1259_s16 }
  0x40   : > { %p26_p13 = scmp.eq.s32.totalorder %s25_s12, 0  ;;  %p36_p10 = scmp.eq.s32.totalorder %s1267_s18, 0 }
  0x41   : > { %p1606_p5 = scmp.eq.s32.totalorder %s1329_s19, 1  ;;  %p1026_p9 = scmp.lt.s32.totalorder %s1267_s18, 2 }
  0x42   : > { %s1430_s14 = scalar_select %p26_p13, %s1263_s17, %s28_s13  }
  0x43   : > { %p37_p3 = por %p36_p10, %p35_p6  ;;  %p1434_p7 = por %p1606_p5, %p35_p6 }
  0x44   : > { %s183_s20 = sand.u32 1, %s1263_s17   ;;  %s902_s28 = sshll.u32 %s1267_s18, 7 }
  0x45   : > { %s1607_s26 = scalar_select %p1434_p7, 1, 0 }
  0x46   : > { %s849_s24 = sshll.u32 %s183_s20, 3  ;;  %s1444_s30 = scalar_lea.hbm %s1594_s0, %s902_s28 }
  0x47   : > { %s187_s5 = scalar_lea.vmem [#allocation2], %s849_s24  ;;  %p1448_p11 = pnand %p1026_p9, %p37_p3 }
  0x48   : > { %s194_s6 = sshll.u32 %s187_s5, 4  ;;  %s1452_s9 = scalar_lea.sflag [#allocation3], %s183_s20  ;;  %s1446_s6 = int_to_ptr.vmem [resolvable:$true] %s194_s6 }
  0x49   : > { %s1167_s10 = scalar_lea.hbm %s1444_s30, 128  ;;  %p1169_p0 = pneg %p1448_p11 }
  0x4a   : > { %p1168_p12 = scmp.ne.s32.totalorder %s1444_s30, %s1167_s10  ;;  %s1172_s24 = scalar_lea.hbm %s1594_s0, 256 }
  0x4b   : > { %p1173_p13 = scmp.lt.u32.totalorder %s1444_s30, %s1594_s0  ;;  %p1174_p6 = scmp.lt.u32.totalorder %s1172_s24, %s1167_s10 }
  0x4c   : > { %p1170_p2 = pnand %p1169_p0, %p1168_p12  ;;  %p1176_p3 = scmp.lt.u32.totalorder %s1167_s10, %s1444_s30 }
  0x4d   : > { %p1175_p10 = por %p1174_p6, %p1173_p13 }
  0x4e   : > { %p1171_p1 = pneg %p1170_p2 }
  0x4f   : > { %p1177_p5 = por %p1176_p3, %p1175_p10 }
  0x51   : > { %p1178_p9 = pnand %p1177_p5, %p1171_p1 }
  0x53   : > { %1181 = shalt.err (!%p1178_p9)
}
  0x54   : > { %s1182_s20 = scalar_lea.vmem %s1446_s6, 128  ;;  %s1275_s29 = smov [#allocation2]  }
  0x55   : > { %p1183_p12 = scmp.ne.s32.totalorder %s1446_s6, %s1182_s20  ;;  %s1187_s5 = sshll.u32 %s1275_s29, 4  ;;  %s1188_s5 = int_to_ptr.vmem [resolvable:$false] %s1187_s5 }
  0x56   : > { %s1189_s12 = scalar_lea.vmem %s1188_s5, 256  ;;  %p1190_p4 = scmp.lt.s32.totalorder %s1446_s6, %s1188_s5 }
  0x57   : > { %p1185_p2 = pnand %p1183_p12, %p1169_p0  ;;  %p1191_p13 = scmp.lt.s32.totalorder %s1189_s12, %s1182_s20 }
  0x59   : > { %p1186_p7 = pneg %p1185_p2  ;;  %p1192_p6 = por %p1191_p13, %p1190_p4 }
  0x5b   : > { %p1193_p10 = pnand %p1192_p6, %p1186_p7 }
  0x5d   : > { %1196 = shalt.err (!%p1193_p10)
}
  0x5e   : > { %1019 = dma.hbm_to_vmem [thread:$0]  (!%p1448_p11), %s1444_s30, 128, %s1446_s6, %s1452_s9, %s1273_s7, %s1273_s7, %s1274_s8  }
  0x5f   : > { %206 = sbr.rel (%p1348_p8) target bundleno = 613 (0x265), region = 36  ;;  %s1486_s10 = sand.u32 (!%p1348_p8), 1, %s1259_s16  }
  0x60   : > { %s853_s13 = sshll.u32 (!%p1348_p8), %s1486_s10, 3  ;;  %s209_s24 = scalar_lea.sflag (!%p1348_p8), [#allocation3], %s1486_s10 }
  0x61   : > { %s212_s28 = scalar_lea.vmem (!%p1348_p8), [#allocation2], %s853_s13  ;;  %p1609_p4 = scmp.ne.s32.totalorder (!%p1348_p8), %s1602_s21, 0 }
  0x66   : > { %1242 = dma.done.wait (%p1609_p4), %s209_s24, 128  }
  0x67   : > { %1244 = vsyncadd (%p1609_p4), %s209_s24, 4294967168  ;;  %p1610_p7 = scmp.eq.s32.totalorder %s1329_s19, 0 }
  0x69   : > { %1246 = dma.done.wait (%p1610_p7), [#allocation6], 4096   ;;  %p1611_p11 = pmov %p1610_p7 }
  0x6a   : > { %v1276_v0 = vmov 0   ;;  %v1277_v1 = vmov 0.0   ;;  %v1074_v2 = vld [vmem:[#allocation5 + $0x4] ss:$8 sps:$4 sm:$0xff]   ;;  %v1076_v3 = vld [vmem:[#allocation5] ss:$8 sps:$4 sm:$0xff]   ;;  %v351_v22 = vlaneseq }
  0x6b   : > { %1248 = vsyncadd (%p1611_p11), [#allocation6], 4294963200  ;;  %340 = vmatprep.mubr.bf16.mxu0 %v1276_v0  ;;  %951 = vmatprep.subr.bf16.mxu1 %v1277_v1  ;;  %v1077_v4 = vld [vmem:[#allocation5 + $0x14] ss:$8 sps:$4 sm:$0xff]   ;;  %v1079_v5 = vld [vmem:[#allocation5 + $0x10] ss:$8 sps:$4 sm:$0xff]  }
  0x6c   : > { %308 = vmatprep.subr.bf16.mxu0 %v1074_v2  ;;  %v1080_v6 = vld [vmem:[#allocation5 + $0x24] ss:$8 sps:$4 sm:$0xff]   ;;  %v1082_v7 = vld [vmem:[#allocation5 + $0x20] ss:$8 sps:$4 sm:$0xff]   ;;  %v1083_v9 = vld [vmem:[#allocation5 + $0x34] ss:$8 sps:$4 sm:$0xff]  }
  0x6d   : > { %309 = vmatpush1.bf16.msra.mxu0 %v1076_v3  ;;  %v1087_v8 = vld [vmem:[#allocation7 + $0x40] sm:$0xff]   ;;  %v1089_v10 = vld [vmem:[#allocation7 + $0x48] sm:$0xff]   ;;  %v1085_v11 = vld [vmem:[#allocation5 + $0x30] ss:$8 sps:$4 sm:$0xff]   ;;  %vm304_vm0 = vcmask 523264   ;;  %v352_v25 = vshrl.u32 %v351_v22, 7 }
  0x6e   : > { %310 = vmatprep.subr.bf16.mxu0 %v1077_v4  ;;  %952 = vmatpush3.bf16.msra.mxu1 %v1087_v8  ;;  %v1091_v12 = vld [vmem:[#allocation7 + $0x50] sm:$0xff]   ;;  %v1088_v14 = vld [vmem:[#allocation7] sm:$0xff]   ;;  %v1090_v15 = vld [vmem:[#allocation7 + $0x8] sm:$0xff]   ;;  %vm1278_vm1 = vmmov 0   ;;  %vm1279_vm5 = vmmov 1   ;;  %s856_s7 = sshll.u32 %s1486_s10, 4 }
  0x6f   : > { %953 = vmatprep.subr.bf16.mxu1 %v1277_v1  ;;  %v1086_v13 = vld [vmem:[%s212_s28] sm:$0xff]   ;;  %v1095_v17 = vld [vmem:[#allocation7 + $0x60] sm:$0xff]   ;;  %v1097_v19 = vld [vmem:[#allocation7 + $0x68] sm:$0xff]   ;;  %v730_v28 = vsub.s32 1, %v352_v25  ;;  %967 = vmatprep.mubr.msk.bf16.mxu1 %vm1278_vm1, %v1277_v1  ;;  %v353_v32 = vsub.s32 0, %v352_v25  ;;  %v367_v38 = vand.u32 15, %v352_v25 }
  0x70   : > { %v1093_v16 = vld [vmem:[#allocation7 + $0x58] sm:$0xff]   ;;  %v1092_v18 = vld [vmem:[#allocation7 + $0x10] sm:$0xff]   ;;  %v1096_v21 = vld [vmem:[#allocation7 + $0x20] sm:$0xff]   ;;  %vm406_vm2 = vcmp.lt.s32.totalorder %v352_v25, 1  ;;  %vm610_vm3 = vcmp.lt.s32.totalorder %v352_v25, 7  ;;  %v362_v60 = vadd.s32 8, %v352_v25 }
  0x71   : > { %311 = vmatpush1.bf16.msra.mxu0 %v1079_v5  ;;  %v1094_v20 = vld [vmem:[#allocation7 + $0x18] sm:$0xff]   ;;  %v1098_v23 = vld [vmem:[#allocation7 + $0x28] sm:$0xff]   ;;  %v1099_v24 = vld [vmem:[#allocation7 + $0x70] sm:$0xff]   ;;  %vm409_vm4 = vcmp.ge.s32.totalorder %v367_v38, 1  ;;  %s244_s8 = scalar_lea.vmem [#allocation8], %s856_s7  ;;  %s903_s6 = sshll.u32 %s1329_s19, 8 }
  0x72   : > { %312 = vmatprep.subr.bf16.mxu0 %v1080_v6  ;;  %954 = vmatpush3.bf16.msra.mxu1 %v1089_v10  ;;  %v1100_v26 = vld [vmem:[#allocation7 + $0x30] sm:$0xff]   ;;  %v1101_v27 = vld [vmem:[#allocation7 + $0x78] sm:$0xff]   ;;  %v1103_v44 = vld [vmem:[#allocation7 + $0x80] sm:$0xff]   ;;  %v374_v62 = vand.u32 15, %v362_v60  ;;  %s752_s30 = sshll.u32 %s244_s8, 4  ;;  %s1550_s27 = scalar_lea.hbm %s1598_s4, %s903_s6  ;;  %s1544_s30 = int_to_ptr.vmem [resolvable:$true] %s752_s30 }
  0x73   : > { %955 = vmatprep.subr.bf16.mxu1 %v1277_v1  ;;  %v250_v29 = vld [vmem:[%s1597_s3] sm:$0x3]  ;;  %v1102_v31 = vld [vmem:[#allocation7 + $0x38] sm:$0xff]   ;;  %vm875_vm6 = vmpackc.low %vm1279_vm5, %vm409_vm4  ;;  %s739_s20 = scalar_lea.sflag [#allocation4], %s1486_s10  ;;  %s1197_s29 = scalar_lea.vmem %s1544_s30, 256 }
  0x74   : > { %v1518_v30 = vrot.slane %v250_v29, %v730_v28  ;;  %v354_v33 = vrot.slane %v250_v29, %v353_v32  ;;  %v1104_v55 = vld [vmem:[#allocation7 + $0x88] sm:$0xff]   ;;  %v1105_v56 = vld [vmem:[#allocation7 + $0x90] sm:$0xff]   ;;  %v1106_v57 = vld [vmem:[#allocation7 + $0x98] sm:$0xff]   ;;  %vm614_vm7 = vcmp.lt.s32.totalorder %v374_v62, 15  ;;  %p1198_p8 = scmp.ne.s32.totalorder %s1544_s30, %s1197_s29  ;;  %p1612_p0 = scmp.ne.s32.totalorder %s1607_s26, 0 }
  0x75   : > { %313 = vmatpush1.bf16.msra.mxu0 %v1082_v7  ;;  %v1107_v58 = vld [vmem:[#allocation7 + $0xa0] sm:$0xff]   ;;  %v1108_v59 = vld [vmem:[#allocation7 + $0xa8] sm:$0xff]   ;;  %v1109_v61 = vld [vmem:[#allocation7 + $0xb0] sm:$0xff]   ;;  %s1280_s19 = smov [#allocation8]  }
  0x76   : > { %314 = vmatprep.subr.bf16.mxu0 %v1083_v9  ;;  %956 = vmatpush3.bf16.msra.mxu1 %v1091_v12  ;;  %v1110_v63 = vld [vmem:[#allocation7 + $0xb8] sm:$0xff]   ;;  %vm894_vm8 = vmpackc.low %vm614_vm7, %vm1279_vm5  ;;  %p1199_p1 = pnand %p1198_p8, %p1612_p0  ;;  %s1201_s5 = sshll.u32 %s1280_s19, 4  ;;  %s1202_s5 = int_to_ptr.vmem [resolvable:$false] %s1201_s5 }
  0x77   : > { %957 = vmatprep.subr.bf16.mxu1 %v1277_v1  ;;  %s1203_s12 = scalar_lea.vmem %s1202_s5, 512  ;;  %p1204_p5 = scmp.lt.s32.totalorder %s1544_s30, %s1202_s5 }
  0x78   : > { %p1200_p3 = pneg %p1199_p1  ;;  %p1205_p9 = scmp.lt.s32.totalorder %s1203_s12, %s1197_s29 }
  0x79   : > { %315 = vmatpush1.bf16.msra.mxu0 %v1085_v11 }
  0x7a   : > { %931 = vmatprep.subr.bf16.mxu0 %v1277_v1  ;;  %958 = vmatpush3.bf16.msra.mxu1 %v1093_v16  ;;  %p1206_p12 = por %p1205_p9, %p1204_p5 }
  0x7b   : > { %959 = vmatprep.subr.bf16.mxu1 %v1277_v1 }
  0x7c   : > { %866 = vmatmul.mubr.msk.bf16.vlgmr.msra.gmra.mrb[0].mxu0 %vm304_vm0, %v1086_v13  ;;  %p1207_p2 = pnand %p1206_p12, %p1200_p3 }
  0x7d   : > { %932 = vmatpush3.bf16.msra.mxu0 %v1088_v14  ;;  %947 = vmatprep.mubr.msk.bf16.mxu0 %vm1278_vm1, %v1277_v1 }
  0x7e   : > { %933 = vmatprep.subr.bf16.mxu0 %v1277_v1  ;;  %960 = vmatpush3.bf16.msra.mxu1 %v1095_v17 }
  0x7f   : > { %961 = vmatprep.subr.bf16.mxu1 %v1277_v1 }
  0x81   : > { %934 = vmatpush3.bf16.msra.mxu0 %v1090_v15 }
  0x82   : > { %935 = vmatprep.subr.bf16.mxu0 %v1277_v1  ;;  %962 = vmatpush3.bf16.msra.mxu1 %v1097_v19 }
  0x83   : > { %963 = vmatprep.subr.bf16.mxu1 %v1277_v1 }
  0x85   : > { %936 = vmatpush3.bf16.msra.mxu0 %v1092_v18 }
  0x86   : > { %937 = vmatprep.subr.bf16.mxu0 %v1277_v1  ;;  %964 = vmatpush3.bf16.msra.mxu1 %v1099_v24 }
  0x87   : > { %965 = vmatprep.subr.bf16.mxu1 %v1277_v1 }
  0x89   : > { %938 = vmatpush3.bf16.msra.mxu0 %v1094_v20 }
  0x8a   : > { %939 = vmatprep.subr.bf16.mxu0 %v1277_v1  ;;  %966 = vmatpush3.bf16.msra.mxu1 %v1101_v27 }
  0x8b   : > { %971 = vmatprep.subr.bf16.mxu1 %v1277_v1 }
  0x8d   : > { %940 = vmatpush3.bf16.msra.mxu0 %v1096_v21 }
  0x8e   : > { %941 = vmatprep.subr.bf16.mxu0 %v1277_v1 }
  0x91   : > { %942 = vmatpush3.bf16.msra.mxu0 %v1098_v23 }
  0x92   : > { %943 = vmatprep.subr.bf16.mxu0 %v1277_v1 }
  0x95   : > { %944 = vmatpush3.bf16.msra.mxu0 %v1100_v26 }
  0x96   : > { %945 = vmatprep.subr.bf16.mxu0 %v1277_v1 }
  0x99   : > { %946 = vmatpush3.bf16.msra.mxu0 %v1102_v31 }
 0x14f   : > { %v342_v34 = vpop.f32.mrb[0].mxu0 }
 0x150   : > { %v355_v35 = vadd.f32 %v354_v33, %v342_v34  ;;  %v1524_v36 = vpop.f32.mrb[1].mxu0 }
 0x151   : > { %v346_v37 = vpop.f32.mrb[2].mxu0 }
 0x152   : > { %v357_v39 = vmax.f32 %v355_v35, 0.0  ;;  %v356_v40 = vadd.f32 %v354_v33, %v346_v37  ;;  %v1526_v41 = vpop.f32.mrb[3].mxu0 }
 0x154   : > { %v358_v42 = vmax.f32 %v356_v40, 0.0  ;;  %v404_v43 = vrot.slane %v357_v39, 7  ;;  %v608_v45 = vrot.slane %v357_v39, 1 }
 0x156   : > { %v405_v46 = vrot.slane %v358_v42, 7  ;;  %v609_v47 = vrot.slane %v358_v42, 1  ;;  %v359_v48 = vpack.c.bf16 %v358_v42, %v357_v39 }
 0x158   : > { %v407_v49 = vsel %vm406_vm2, %v404_v43, %v405_v46  ;;  %v408_v50 = vsel %vm406_vm2, %v405_v46, %v404_v43  ;;  %v611_v51 = vsel %vm610_vm3, %v608_v45, %v609_v47  ;;  %v612_v52 = vsel %vm610_vm3, %v609_v47, %v608_v45  ;;  %968 = vmatmul.mubr.bf16.vlgmr.msra.gmra.mrb[0].mxu1 %v359_v48 }
 0x159   : > { %v876_v53 = vpack.c.bf16 %v407_v49, %v408_v50  ;;  %v895_v54 = vpack.c.bf16 %v612_v52, %v611_v51  ;;  %972 = vmatpush3.bf16.msra.mxu1 %v1103_v44  ;;  %987 = vmatprep.mubr.msk.bf16.mxu1 %vm1278_vm1, %v1277_v1 }
 0x15a   : > { %973 = vmatprep.subr.bf16.mxu1 %v1277_v1 }
 0x15b   : > { %948 = vmatmul.mubr.msk.bf16.vlgmr.msra.gmra.mrb[4].mxu0 %vm875_vm6, %v876_v53 }
 0x15d   : > { %974 = vmatpush3.bf16.msra.mxu1 %v1104_v55 }
 0x15e   : > { %975 = vmatprep.subr.bf16.mxu1 %v1277_v1 }
 0x161   : > { %976 = vmatpush3.bf16.msra.mxu1 %v1105_v56 }
 0x162   : > { %977 = vmatprep.subr.bf16.mxu1 %v1277_v1 }
 0x165   : > { %978 = vmatpush3.bf16.msra.mxu1 %v1106_v57 }
 0x166   : > { %979 = vmatprep.subr.bf16.mxu1 %v1277_v1 }
 0x169   : > { %980 = vmatpush3.bf16.msra.mxu1 %v1107_v58 }
 0x16a   : > { %981 = vmatprep.subr.bf16.mxu1 %v1277_v1 }
 0x16d   : > { %982 = vmatpush3.bf16.msra.mxu1 %v1108_v59 }
 0x16e   : > { %983 = vmatprep.subr.bf16.mxu1 %v1277_v1 }
 0x171   : > { %984 = vmatpush3.bf16.msra.mxu1 %v1109_v61 }
 0x172   : > { %985 = vmatprep.subr.bf16.mxu1 %v1277_v1 }
 0x175   : > { %986 = vmatpush3.bf16.msra.mxu1 %v1110_v63 }
 0x178   : > { %988 = vmatmul.mubr.msk.bf16.vlgmr.msra.gmra.mrb[0].mxu1 %vm894_vm8, %v895_v54 }
 0x22e   : > { %v512_v0 = vpop.f32.mrb[4].mxu0 }
 0x22f   : > { %v949_v2 = vpop.f32.mrb[5].mxu0 }
 0x230   : > { %v515_v3 = vpop.f32.mrb[6].mxu0 }
 0x231   : > { %v950_v4 = vpop.f32.mrb[7].mxu0 }
 0x24b   : > { %v717_v5 = vpop.f32.mrb[0].mxu1 }
 0x24c   : > { %v991_v6 = vadd.f32 %v717_v5, %v512_v0  ;;  %v989_v7 = vpop.f32.mrb[1].mxu1 }
 0x24d   : > { %v720_v8 = vpop.f32.mrb[2].mxu1 }
 0x24e   : > { %v726_v9 = vadd.f32 %v991_v6, %v1524_v36  ;;  %v992_v10 = vadd.f32 %v720_v8, %v515_v3  ;;  %v990_v1 = vpop.f32.mrb[3].mxu1 }
 0x250   : > { %v732_v11 = vadd.f32 %v1518_v30, %v726_v9  ;;  %v727_v12 = vadd.f32 %v992_v10, %v1526_v41 }
 0x252   : > { %v734_v13 = vmax.f32 %v732_v11, 0.0  ;;  %v733_v14 = vadd.f32 %v1518_v30, %v727_v12 }
 0x254   : > { %736 = vst [vmem:[%s244_s8] sm:$0xff] %v734_v13  ;;  %v735_v15 = vmax.f32 %v733_v14, 0.0 }
 0x256   : > { %737 = vst [vmem:[%s244_s8 + $0x8] sm:$0xff] %v735_v15 }
 0x257   : > { %1210 = shalt.err (!%p1207_p2)
}
 0x258   : > { %s1211_s13 = scalar_lea.hbm %s1550_s27, 256  ;;  %s1215_s21 = scalar_lea.hbm %s1598_s4, 512 }
 0x259   : > { %p1212_p13 = scmp.ne.s32.totalorder %s1550_s27, %s1211_s13  ;;  %p1216_p4 = scmp.lt.u32.totalorder %s1550_s27, %s1598_s4 }
 0x25a   : > { %p1217_p7 = scmp.lt.u32.totalorder %s1215_s21, %s1211_s13  ;;  %p1219_p8 = scmp.lt.u32.totalorder %s1211_s13, %s1550_s27 }
 0x25b   : > { %p1213_p6 = pnand %p1212_p13, %p1612_p0 }
 0x25c   : > { %p1218_p11 = por %p1217_p7, %p1216_p4 }
 0x25d   : > { %p1214_p10 = pneg %p1213_p6 }
 0x25e   : > { %p1220_p1 = por %p1219_p8, %p1218_p11 }
 0x260   : > { %p1221_p3 = pnand %p1220_p1, %p1214_p10 }
 0x262   : > { %1224 = shalt.err (!%p1221_p3)
}
 0x263   : > { %s1281_s8 = smov 128   ;;  %s1282_s6 = smov 8  }
 0x264   : > { %1007 = dma.vmem_to_hbm [thread:$0]  (%p1612_p0), %s1544_s30, 256, %s1550_s27, %s739_s20, %s1281_s8, %s1281_s8, %s1282_s6  }
 0x265 PF: > { %s767_s25 = sand.u32 1, %s1255_s15   ;;  %p1613_p5 = scmp.ne.s32.totalorder %s1603_s22, 0 }
 0x266   : > { %p1614_p9 = scmp.ge.s32.totalorder %s1267_s18, 2  ;;  %s768_s9 = scalar_lea.sflag [#allocation4], %s767_s25 }
 0x268   : > { %p1021_p12 = pnand %p1614_p9, %p1613_p5 }
 0x26a   : > { %1250 = dma.done.wait (!%p1021_p12), %s768_s9, 256  }
 0x26b   : > { %1252 = vsyncadd (!%p1021_p12), %s768_s9, 4294967040  ;;  %p18_p2 = scmp.ge.s32.totalorder %s1421_s11, 4   ;;  %s1615_s15 = smov %s1259_s16 }
 0x26c   : > { %s1616_s16 = smov %s1263_s17  ;;  %s1617_s17 = smov %s1430_s14 }
 0x26d   : > { %s1618_s18 = smov %s1421_s11  ;;  %20 = sbr.rel (!%p18_p2) target bundleno = 6 (0x6), region = 91 }
 0x274   :  { %773 = vsyncpa [#allocation3], 1 }
 0x275   :  { %775 = vsyncpa [#allocation3 + $0x1], 1 }
 0x276   :  { %776 = vsyncpa [#allocation6], 1 }
 0x277   :  { %777 = vsyncpa [#allocation4], 1 }
 0x278   :  { %779 = vsyncpa [#allocation4 + $0x1], 1 }

</bundles_post_ra>
